<compile_context>
chip_gen: v7x
topology: tpu7x:2x2x1
jax: 0.10.0
libtpu: 0.0.40
codegen_flags: <defaults>
</compile_context>

<pallas_src>
import jax
import jax.numpy as jnp
from jax.experimental import pallas as pl
from jax.experimental.pallas import tpu as pltpu


def rnn_kernel(u_ref, wht_ref, h_ref):
    """u_ref: (T, HP) precomputed input projections (row layout, lane-padded).
    wht_ref: (HP, HP) = W_h^T zero-padded.  h_ref: (1, HP) final hidden state."""
    T, HP = u_ref.shape

    u = u_ref[...]          # (T, HP) — a handful of vregs, loaded once
    wht = wht_ref[...]      # (HP, HP) — resident for the whole recurrence

    # Fully unrolled sequential recurrence; h lives in vregs, stored once at end.
    h = jnp.zeros((1, HP), jnp.float32)
    for i in range(T):      # T is static -> static slices, fully unrolled
        pre = u[i:i + 1, :] + jnp.dot(h, wht, preferred_element_type=jnp.float32)
        h = jnp.tanh(pre)   # EUP transcendental, f32

    h_ref[...] = h          # single lane-dense store


def rnn_forward(x, w_in, b_in, w_h, b_h):
    """x: (T, I, 1) float32. Returns final hidden state (H, 1) float32."""
    T, I, _ = x.shape
    H = w_in.shape[0]
    HP = ((H + 127) // 128) * 128            # pad hidden dim to full lane width

    # --- one-time preprocessing outside the latency-critical kernel ---
    # U[t] = (W_in @ x_t + b_in + b_h)^T  ->  row layout (T, H), then lane-pad.
    xm = x[:, :, 0].astype(jnp.float32)                       # (T, I)
    u = xm @ w_in.T + (b_in + b_h)[:, 0][None, :]              # (T, H)
    u = jnp.pad(u, ((0, 0), (0, HP - H)))                      # (T, HP)

    # W_h^T zero-padded to (HP, HP): padded columns are zero so padded output
    # lanes stay 0; padded rows multiply h's zero padded lanes.
    wht = jnp.pad(w_h.T.astype(jnp.float32), ((0, HP - H), (0, HP - H)))

    h_row = pl.pallas_call(
        rnn_kernel,
        out_shape=jax.ShapeDtypeStruct((1, HP), jnp.float32),
        in_specs=[
            pl.BlockSpec(memory_space=pltpu.MemorySpace.VMEM),   # U   (T, HP)
            pl.BlockSpec(memory_space=pltpu.MemorySpace.VMEM),   # W_h^T (HP, HP)
        ],
        out_specs=pl.BlockSpec(memory_space=pltpu.MemorySpace.VMEM),
    )(u, wht)

    # Back to the module's (H, 1) column-vector contract.
    return h_row[0, :H].reshape(H, 1)


def rnn_reference(x, w_in, b_in, w_h, b_h):
    """Pure-JAX reference mirroring the PyTorch module exactly."""
    H = w_in.shape[0]
    h = jnp.zeros((H, 1), jnp.float32)
    for i in range(x.shape[0]):
        h = jnp.tanh(w_in @ x[i] + b_in + w_h @ h + b_h)
    return h


if __name__ == "__main__":
    # Small shapes consistent with the module: seq=8, input=8, hidden=32.
    T, I, H = 8, 8, 32

    key = jax.random.PRNGKey(0)
    k_x, k_win, k_bin, k_wh, k_bh = jax.random.split(key, 5)

    # torch.rand -> uniform [0, 1)
    w_in = jax.random.uniform(k_win, (H, I), jnp.float32)
    b_in = jax.random.uniform(k_bin, (H, 1), jnp.float32)
    w_h = jax.random.uniform(k_wh, (H, H), jnp.float32)
    b_h = jax.random.uniform(k_bh, (H, 1), jnp.float32)

    x = jax.random.normal(k_x, (T, I, 1), jnp.float32)

    out = rnn_forward(x, w_in, b_in, w_h, b_h)
    out = jax.block_until_ready(out)

    ref = rnn_reference(x, w_in, b_in, w_h, b_h)
    assert out.shape == (H, 1)
    assert jnp.allclose(out, ref, atol=1e-4, rtol=1e-4), (out, ref)

    # TODO(synk): the `cb` ticket / custom-autograd (cbon=True) path and the
    # backward pass are training-side hooks with no Pallas forward equivalent.

    print("KERNEL_OK")
</pallas_src>

<mosaic_0001>
module attributes {stable_mosaic.version = 11 : i64} {
  func.func @rnn_kernel(%arg0: memref<8x128xf32, #tpu.memory_space<vmem>>, %arg1: memref<128x128xf32, #tpu.memory_space<vmem>>, %arg2: memref<1x128xf32, #tpu.memory_space<vmem>>) attributes {dimension_semantics = [], scalar_prefetch = 0 : i64, scratch_operands = 0 : i64, tpu.core_type = #tpu.core_type<tc>} {
    %c0 = arith.constant 0 : index
    %c0_0 = arith.constant 0 : index
    %0 = vector.load %arg0[%c0, %c0_0] : memref<8x128xf32, #tpu.memory_space<vmem>>, vector<8x128xf32>
    %c0_1 = arith.constant 0 : index
    %c0_2 = arith.constant 0 : index
    %1 = vector.load %arg1[%c0_1, %c0_2] : memref<128x128xf32, #tpu.memory_space<vmem>>, vector<128x128xf32>
    %cst = arith.constant 0.000000e+00 : f32
    %2 = vector.broadcast %cst : f32 to vector<1x128xf32>
    %3 = vector.extract_strided_slice %0 {offsets = [0, 0], sizes = [1, 128], strides = [1, 1]} : vector<8x128xf32> to vector<1x128xf32>
    %cst_3 = arith.constant dense<0.000000e+00> : vector<1x128xf32>
    %4 = tpu.matmul %2, %1, %cst_3 {dimension_numbers = #tpu.dot_dimension_numbers<[1], [0], [0], [1], [0, 0, 1, 1], [], []>} : vector<1x128xf32>, vector<128x128xf32>, vector<1x128xf32> -> vector<1x128xf32>
    %5 = arith.addf %3, %4 : vector<1x128xf32>
    %6 = math.tanh %5 : vector<1x128xf32>
    %7 = vector.extract_strided_slice %0 {offsets = [1, 0], sizes = [1, 128], strides = [1, 1]} : vector<8x128xf32> to vector<1x128xf32>
    %cst_4 = arith.constant dense<0.000000e+00> : vector<1x128xf32>
    %8 = tpu.matmul %6, %1, %cst_4 {dimension_numbers = #tpu.dot_dimension_numbers<[1], [0], [0], [1], [0, 0, 1, 1], [], []>} : vector<1x128xf32>, vector<128x128xf32>, vector<1x128xf32> -> vector<1x128xf32>
    %9 = arith.addf %7, %8 : vector<1x128xf32>
    %10 = math.tanh %9 : vector<1x128xf32>
    %11 = vector.extract_strided_slice %0 {offsets = [2, 0], sizes = [1, 128], strides = [1, 1]} : vector<8x128xf32> to vector<1x128xf32>
    %cst_5 = arith.constant dense<0.000000e+00> : vector<1x128xf32>
    %12 = tpu.matmul %10, %1, %cst_5 {dimension_numbers = #tpu.dot_dimension_numbers<[1], [0], [0], [1], [0, 0, 1, 1], [], []>} : vector<1x128xf32>, vector<128x128xf32>, vector<1x128xf32> -> vector<1x128xf32>
    %13 = arith.addf %11, %12 : vector<1x128xf32>
    %14 = math.tanh %13 : vector<1x128xf32>
    %15 = vector.extract_strided_slice %0 {offsets = [3, 0], sizes = [1, 128], strides = [1, 1]} : vector<8x128xf32> to vector<1x128xf32>
    %cst_6 = arith.constant dense<0.000000e+00> : vector<1x128xf32>
    %16 = tpu.matmul %14, %1, %cst_6 {dimension_numbers = #tpu.dot_dimension_numbers<[1], [0], [0], [1], [0, 0, 1, 1], [], []>} : vector<1x128xf32>, vector<128x128xf32>, vector<1x128xf32> -> vector<1x128xf32>
    %17 = arith.addf %15, %16 : vector<1x128xf32>
    %18 = math.tanh %17 : vector<1x128xf32>
    %19 = vector.extract_strided_slice %0 {offsets = [4, 0], sizes = [1, 128], strides = [1, 1]} : vector<8x128xf32> to vector<1x128xf32>
    %cst_7 = arith.constant dense<0.000000e+00> : vector<1x128xf32>
    %20 = tpu.matmul %18, %1, %cst_7 {dimension_numbers = #tpu.dot_dimension_numbers<[1], [0], [0], [1], [0, 0, 1, 1], [], []>} : vector<1x128xf32>, vector<128x128xf32>, vector<1x128xf32> -> vector<1x128xf32>
    %21 = arith.addf %19, %20 : vector<1x128xf32>
    %22 = math.tanh %21 : vector<1x128xf32>
    %23 = vector.extract_strided_slice %0 {offsets = [5, 0], sizes = [1, 128], strides = [1, 1]} : vector<8x128xf32> to vector<1x128xf32>
    %cst_8 = arith.constant dense<0.000000e+00> : vector<1x128xf32>
    %24 = tpu.matmul %22, %1, %cst_8 {dimension_numbers = #tpu.dot_dimension_numbers<[1], [0], [0], [1], [0, 0, 1, 1], [], []>} : vector<1x128xf32>, vector<128x128xf32>, vector<1x128xf32> -> vector<1x128xf32>
    %25 = arith.addf %23, %24 : vector<1x128xf32>
    %26 = math.tanh %25 : vector<1x128xf32>
    %27 = vector.extract_strided_slice %0 {offsets = [6, 0], sizes = [1, 128], strides = [1, 1]} : vector<8x128xf32> to vector<1x128xf32>
    %cst_9 = arith.constant dense<0.000000e+00> : vector<1x128xf32>
    %28 = tpu.matmul %26, %1, %cst_9 {dimension_numbers = #tpu.dot_dimension_numbers<[1], [0], [0], [1], [0, 0, 1, 1], [], []>} : vector<1x128xf32>, vector<128x128xf32>, vector<1x128xf32> -> vector<1x128xf32>
    %29 = arith.addf %27, %28 : vector<1x128xf32>
    %30 = math.tanh %29 : vector<1x128xf32>
    %31 = vector.extract_strided_slice %0 {offsets = [7, 0], sizes = [1, 128], strides = [1, 1]} : vector<8x128xf32> to vector<1x128xf32>
    %cst_10 = arith.constant dense<0.000000e+00> : vector<1x128xf32>
    %32 = tpu.matmul %30, %1, %cst_10 {dimension_numbers = #tpu.dot_dimension_numbers<[1], [0], [0], [1], [0, 0, 1, 1], [], []>} : vector<1x128xf32>, vector<128x128xf32>, vector<1x128xf32> -> vector<1x128xf32>
    %33 = arith.addf %31, %32 : vector<1x128xf32>
    %34 = math.tanh %33 : vector<1x128xf32>
    %c0_11 = arith.constant 0 : index
    %c0_12 = arith.constant 0 : index
    %35 = vector.load %arg2[%c0_11, %c0_12] : memref<1x128xf32, #tpu.memory_space<vmem>>, vector<1x128xf32>
    tpu.vector_store %arg2[%c0_11, %c0_12], %34 {strides = array<i32>} : memref<1x128xf32, #tpu.memory_space<vmem>>, vector<1x128xf32>,
    return
  }
}

</mosaic_0001>

<bundles_post_ra>
// kernel: tpu_custom_call.1
= control target key start
LH: loop header
LB: loop body
LE: loop exit
PB: predicated region body
PF: predicated region fallthrough
CT: control target
= control target key end

     0   :  { %7 = vsyncpa [#allocation3], 0  ;;  %s1628_s0 = inlined_call_operand.hbm [shape: f32[8,128], index: 0, kind: input, shape index: {}]   ;;  %s1629_s1 = inlined_call_operand.hbm [shape: f32[128,128], index: 1, kind: input, shape index: {}]   ;;  %s1630_s2 = inlined_call_operand.hbm [shape: f32[1,128], index: 2, kind: output, shape index: {}]  }
   0x1   :  { %8 = vsyncpa [#allocation6], 0 }
   0x2   :  { %9 = vsyncpa [#allocation4], 0  ;;  %s1391_s9 = smov [#allocation2]   ;;  %s1392_s11 = smov [#allocation5]  }
   0x3   :  { %s16_s10 = sshll.u32 %s1391_s9, 4  ;;  %s25_s12 = sshll.u32 %s1392_s11, 4  ;;  %s17_s10 = int_to_ptr.vmem [resolvable:$true] %s16_s10  ;;  %s1414_s12 = int_to_ptr.vmem [resolvable:$true] %s25_s12 }
   0x4   :  { %s1319_s15 = scalar_lea.hbm %s1628_s0, 128 }
   0x5   :  { %p1320_p0 = scmp.ne.s32.totalorder %s1628_s0, %s1319_s15  ;;  %p1323_p1 = scmp.lt.u32.totalorder %s1319_s15, %s1628_s0 }
   0x7   :  { %p1325_p2 = pnand %p1323_p1, %p1320_p0 }
   0x9   :  { %1328 = shalt.err (!%p1325_p2)
}
   0xa   :  { %s1329_s20 = scalar_lea.vmem %s17_s10, 128  ;;  %p1334_p4 = scmp.lt.s32.totalorder %s17_s10, %s17_s10 }
   0xb   :  { %p1330_p3 = scmp.ne.s32.totalorder %s17_s10, %s1329_s20  ;;  %p1335_p5 = scmp.lt.s32.totalorder %s1329_s20, %s1329_s20 }
   0xd   :  { %p1336_p6 = por %p1335_p5, %p1334_p4 }
   0xf   :  { %p1337_p7 = pnand %p1336_p6, %p1330_p3 }
  0x11   :  { %1340 = shalt.err (!%p1337_p7)
}
  0x12   :  { %19 = dma.hbm_to_vmem [thread:$0]  %s1628_s0, 128, %s17_s10, [#allocation3]  }
  0x13   :  { %s1341_s25 = scalar_lea.hbm %s1629_s1, 2048 }
  0x14   :  { %p1342_p8 = scmp.ne.s32.totalorder %s1629_s1, %s1341_s25  ;;  %p1345_p9 = scmp.lt.u32.totalorder %s1341_s25, %s1629_s1 }
  0x16   :  { %p1347_p10 = pnand %p1345_p9, %p1342_p8 }
  0x18   :  { %1350 = shalt.err (!%p1347_p10)
}
  0x19   :  { %s1351_s30 = scalar_lea.vmem %s1414_s12, 2048  ;;  %p1356_p12 = scmp.lt.s32.totalorder %s1414_s12, %s1414_s12 }
  0x1a   :  { %p1352_p11 = scmp.ne.s32.totalorder %s1414_s12, %s1351_s30  ;;  %p1357_p13 = scmp.lt.s32.totalorder %s1351_s30, %s1351_s30 }
  0x1c   :  { %p1358_p0 = por %p1357_p13, %p1356_p12 }
  0x1e   :  { %p1359_p1 = pnand %p1358_p0, %p1352_p11 }
  0x20   :  { %1362 = shalt.err (!%p1359_p1)
}
  0x21   :  { %s1393_s0 = smov 128   ;;  %s1394_s3 = smov 8  }
  0x22   :  { %31 = dma.hbm_to_vmem [thread:$0]  %s1629_s1, 2048, %s1414_s12, [#allocation6], %s1393_s0, %s1393_s0, %s1394_s3  }
  0x23   :  { %1385 = dma.done.wait [#allocation3], 128  }
  0x24   :  { %1386 = vsyncadd [#allocation3], 4294967168 }
  0x25   :  { %1387 = dma.done.wait [#allocation6], 2048  }
  0x26   :  { %1388 = vsyncadd [#allocation6], 4294965248  ;;  %v1395_v0 = vmov 0.0|0.0   ;;  %vm1396_vm0 = vmmov 0   ;;  %v1397_v1 = vmov 0.0   ;;  %v39_v2 = vld [vmem:[#allocation5] sm:$0xff] }
  0x27   :  { %1103 = vmatprep.subr.bf16.mxu0 %v1395_v0  ;;  %855 = vmatprep.mubr.msk.f32.mxu0 %vm1396_vm0, %v1397_v1  ;;  %v40_v3 = vld [vmem:[#allocation5 + $0x8] sm:$0xff]  ;;  %v41_v4 = vld [vmem:[#allocation5 + $0x10] sm:$0xff]  ;;  %v42_v6 = vld [vmem:[#allocation5 + $0x18] sm:$0xff]  ;;  %s1398_s1 = smov [#allocation7]  }
  0x28   :  { %1127 = vmatprep.subr.bf16.mxu1 %v1395_v0  ;;  %890 = vmatprep.mubr.msk.f32.mxu1 %vm1396_vm0, %v1397_v1  ;;  %v1451_v5 = vpack.c.bf16 %v40_v3, %v39_v2  ;;  %v1454_v7 = vpack.c.bf16 %v42_v6, %v41_v4  ;;  %v43_v8 = vld [vmem:[#allocation5 + $0x20] sm:$0xff]  ;;  %v44_v9 = vld [vmem:[#allocation5 + $0x28] sm:$0xff]  ;;  %v45_v11 = vld [vmem:[#allocation5 + $0x30] sm:$0xff]  ;;  %s677_s6 = sshll.u32 %s1398_s1, 4  ;;  %s678_s6 = int_to_ptr.vmem [resolvable:$true] %s677_s6 }
  0x29   :  { %v1460_v10 = vpack.c.bf16 %v44_v9, %v43_v8  ;;  %v46_v12 = vld [vmem:[#allocation5 + $0x38] sm:$0xff]  ;;  %v47_v14 = vld [vmem:[#allocation5 + $0x40] sm:$0xff]  ;;  %v48_v15 = vld [vmem:[#allocation5 + $0x48] sm:$0xff]  ;;  %s1363_s7 = scalar_lea.vmem %s678_s6, 16  ;;  %s1367_s8 = scalar_lea.vmem %s678_s6, 32 }
  0x2a   :  { %1105 = vmatpush3.bf16.msra.mxu0 %v1451_v5  ;;  %1129 = vmatpush3.bf16.msra.mxu1 %v1451_v5  ;;  %v1466_v13 = vpack.c.bf16 %v46_v12, %v45_v11  ;;  %v1472_v16 = vpack.c.bf16 %v48_v15, %v47_v14  ;;  %v49_v17 = vld [vmem:[#allocation5 + $0x50] sm:$0xff]  ;;  %v50_v18 = vld [vmem:[#allocation5 + $0x58] sm:$0xff]  ;;  %v51_v20 = vld [vmem:[#allocation5 + $0x60] sm:$0xff]  ;;  %p1364_p2 = scmp.ne.s32.totalorder %s678_s6, %s1363_s7  ;;  %p1368_p3 = scmp.lt.s32.totalorder %s678_s6, %s678_s6 }
  0x2b   :  { %1106 = vmatprep.subr.bf16.mxu0 %v1395_v0  ;;  %1130 = vmatprep.subr.bf16.mxu1 %v1395_v0  ;;  %v1478_v19 = vpack.c.bf16 %v50_v18, %v49_v17  ;;  %v52_v21 = vld [vmem:[#allocation5 + $0x68] sm:$0xff]  ;;  %v53_v23 = vld [vmem:[#allocation5 + $0x70] sm:$0xff]  ;;  %v54_v24 = vld [vmem:[#allocation5 + $0x78] sm:$0xff]  ;;  %p1369_p4 = scmp.lt.s32.totalorder %s1367_s8, %s1363_s7 }
  0x2c   :  { %v1484_v22 = vpack.c.bf16 %v52_v21, %v51_v20  ;;  %v1490_v25 = vpack.c.bf16 %v54_v24, %v53_v23  ;;  %v1518_v26 = vld [vmem:[#allocation2] sm:$0xff] }
  0x2d   :  { %p1370_p5 = por %p1369_p4, %p1368_p3 }
  0x2e   :  { %1108 = vmatpush3.bf16.msra.mxu0 %v1454_v7  ;;  %1132 = vmatpush3.bf16.msra.mxu1 %v1454_v7 }
  0x2f   :  { %1109 = vmatprep.subr.bf16.mxu0 %v1395_v0  ;;  %1133 = vmatprep.subr.bf16.mxu1 %v1395_v0  ;;  %p1371_p6 = pnand %p1370_p5, %p1364_p2 }
  0x32   :  { %1111 = vmatpush3.bf16.msra.mxu0 %v1460_v10  ;;  %1135 = vmatpush3.bf16.msra.mxu1 %v1460_v10 }
  0x33   :  { %1112 = vmatprep.subr.bf16.mxu0 %v1395_v0  ;;  %1136 = vmatprep.subr.bf16.mxu1 %v1395_v0 }
  0x36   :  { %1114 = vmatpush3.bf16.msra.mxu0 %v1466_v13  ;;  %1138 = vmatpush3.bf16.msra.mxu1 %v1466_v13 }
  0x37   :  { %1115 = vmatprep.subr.bf16.mxu0 %v1395_v0  ;;  %1139 = vmatprep.subr.bf16.mxu1 %v1395_v0 }
  0x3a   :  { %1117 = vmatpush3.bf16.msra.mxu0 %v1472_v16  ;;  %1141 = vmatpush3.bf16.msra.mxu1 %v1472_v16 }
  0x3b   :  { %1118 = vmatprep.subr.bf16.mxu0 %v1395_v0  ;;  %1142 = vmatprep.subr.bf16.mxu1 %v1395_v0 }
  0x3e   :  { %1120 = vmatpush3.bf16.msra.mxu0 %v1478_v19  ;;  %1144 = vmatpush3.bf16.msra.mxu1 %v1478_v19 }
  0x3f   :  { %1121 = vmatprep.subr.bf16.mxu0 %v1395_v0  ;;  %1145 = vmatprep.subr.bf16.mxu1 %v1395_v0 }
  0x42   :  { %1123 = vmatpush3.bf16.msra.mxu0 %v1484_v22  ;;  %1147 = vmatpush3.bf16.msra.mxu1 %v1484_v22 }
  0x43   :  { %1124 = vmatprep.subr.bf16.mxu0 %v1395_v0  ;;  %1148 = vmatprep.subr.bf16.mxu1 %v1395_v0 }
  0x46   :  { %1126 = vmatpush3.bf16.msra.mxu0 %v1490_v25  ;;  %1150 = vmatpush3.bf16.msra.mxu1 %v1490_v25 }
  0x47   :  { %1151 = vmatprep.subr.bf16.mxu0 %v1395_v0  ;;  %1175 = vmatprep.subr.bf16.mxu1 %v1395_v0 }
  0x49   :  { %856 = vmatmul.mubr.f32.vlgmr.msra.gmra.mrb[0].mxu0 %v1397_v1 }
  0x4a   :  { %1153 = vmatpush3.bf16.msra.mxu0 %v1451_v5  ;;  %925 = vmatprep.mubr.msk.f32.mxu0 %vm1396_vm0, %v1397_v1 }
  0x4b   :  { %1154 = vmatprep.subr.bf16.mxu0 %v1395_v0 }
  0x4e   :  { %1156 = vmatpush3.bf16.msra.mxu0 %v1454_v7 }
  0x4f   :  { %1157 = vmatprep.subr.bf16.mxu0 %v1395_v0 }
  0x52   :  { %1159 = vmatpush3.bf16.msra.mxu0 %v1460_v10 }
  0x53   :  { %1160 = vmatprep.subr.bf16.mxu0 %v1395_v0 }
  0x56   :  { %1162 = vmatpush3.bf16.msra.mxu0 %v1466_v13 }
  0x57   :  { %1163 = vmatprep.subr.bf16.mxu0 %v1395_v0 }
  0x5a   :  { %1165 = vmatpush3.bf16.msra.mxu0 %v1472_v16 }
  0x5b   :  { %1166 = vmatprep.subr.bf16.mxu0 %v1395_v0 }
  0x5e   :  { %1168 = vmatpush3.bf16.msra.mxu0 %v1478_v19 }
  0x5f   :  { %1169 = vmatprep.subr.bf16.mxu0 %v1395_v0 }
  0x62   :  { %1171 = vmatpush3.bf16.msra.mxu0 %v1484_v22 }
  0x63   :  { %1172 = vmatprep.subr.bf16.mxu0 %v1395_v0 }
  0x66   :  { %1174 = vmatpush3.bf16.msra.mxu0 %v1490_v25 }
  0x67   :  { %1199 = vmatprep.subr.bf16.mxu0 %v1395_v0 }
 0x11c   :  { %v121_v27 = vpop.f32.mrb[0].mxu0 }
 0x11d   :  { %v125_v28 = vadd.f32 %v121_v27, %v1518_v26  ;;  %v857_v29 = vpop.f32.mrb[1].mxu0 }
 0x11f   :  { %1303 = vtanh.f32 %v125_v28 }
 0x129   :  { %v1304_v30 = vpop.eup %1303 }
 0x12a   :  { %891 = vmatmul.mubr.f32.vlgmr.msra.gmra.mrb[0].mxu1 %v1304_v30 }
 0x12b   :  { %1177 = vmatpush3.bf16.msra.mxu1 %v1451_v5  ;;  %960 = vmatprep.mubr.msk.f32.mxu1 %vm1396_vm0, %v1397_v1 }
 0x12c   :  { %1178 = vmatprep.subr.bf16.mxu1 %v1395_v0 }
 0x12f   :  { %1180 = vmatpush3.bf16.msra.mxu1 %v1454_v7 }
 0x130   :  { %1181 = vmatprep.subr.bf16.mxu1 %v1395_v0 }
 0x133   :  { %1183 = vmatpush3.bf16.msra.mxu1 %v1460_v10 }
 0x134   :  { %1184 = vmatprep.subr.bf16.mxu1 %v1395_v0 }
 0x137   :  { %1186 = vmatpush3.bf16.msra.mxu1 %v1466_v13 }
 0x138   :  { %1187 = vmatprep.subr.bf16.mxu1 %v1395_v0 }
 0x13b   :  { %1189 = vmatpush3.bf16.msra.mxu1 %v1472_v16 }
 0x13c   :  { %1190 = vmatprep.subr.bf16.mxu1 %v1395_v0 }
 0x13f   :  { %1192 = vmatpush3.bf16.msra.mxu1 %v1478_v19 }
 0x140   :  { %1193 = vmatprep.subr.bf16.mxu1 %v1395_v0 }
 0x143   :  { %1195 = vmatpush3.bf16.msra.mxu1 %v1484_v22 }
 0x144   :  { %1196 = vmatprep.subr.bf16.mxu1 %v1395_v0 }
 0x147   :  { %1198 = vmatpush3.bf16.msra.mxu1 %v1490_v25 }
 0x148   :  { %1223 = vmatprep.subr.bf16.mxu1 %v1395_v0 }
 0x1fd   :  { %v193_v31 = vpop.f32.mrb[0].mxu1 }
 0x1fe   :  { %v198_v32 = vrot.slane %v193_v31, 7  ;;  %v892_v33 = vpop.f32.mrb[1].mxu1 }
 0x200   :  { %v200_v34 = vadd.f32 %v198_v32, %v1518_v26 }
 0x202   :  { %1305 = vtanh.f32 %v200_v34 }
 0x20c   :  { %v1306_v35 = vpop.eup %1305 }
 0x20d   :  { %v203_v36 = vrot.slane %v1306_v35, 1 }
 0x20f   :  { %926 = vmatmul.mubr.f32.vlgmr.msra.gmra.mrb[2].mxu0 %v203_v36 }
 0x210   :  { %1201 = vmatpush3.bf16.msra.mxu0 %v1451_v5  ;;  %995 = vmatprep.mubr.msk.f32.mxu0 %vm1396_vm0, %v1397_v1 }
 0x211   :  { %1202 = vmatprep.subr.bf16.mxu0 %v1395_v0 }
 0x214   :  { %1204 = vmatpush3.bf16.msra.mxu0 %v1454_v7 }
 0x215   :  { %1205 = vmatprep.subr.bf16.mxu0 %v1395_v0 }
 0x218   :  { %1207 = vmatpush3.bf16.msra.mxu0 %v1460_v10 }
 0x219   :  { %1208 = vmatprep.subr.bf16.mxu0 %v1395_v0 }
 0x21c   :  { %1210 = vmatpush3.bf16.msra.mxu0 %v1466_v13 }
 0x21d   :  { %1211 = vmatprep.subr.bf16.mxu0 %v1395_v0 }
 0x220   :  { %1213 = vmatpush3.bf16.msra.mxu0 %v1472_v16 }
 0x221   :  { %1214 = vmatprep.subr.bf16.mxu0 %v1395_v0 }
 0x224   :  { %1216 = vmatpush3.bf16.msra.mxu0 %v1478_v19 }
 0x225   :  { %1217 = vmatprep.subr.bf16.mxu0 %v1395_v0 }
 0x228   :  { %1219 = vmatpush3.bf16.msra.mxu0 %v1484_v22 }
 0x229   :  { %1220 = vmatprep.subr.bf16.mxu0 %v1395_v0 }
 0x22c   :  { %1222 = vmatpush3.bf16.msra.mxu0 %v1490_v25 }
 0x22d   :  { %1247 = vmatprep.subr.bf16.mxu0 %v1395_v0 }
 0x2e2   :  { %v271_v37 = vpop.f32.mrb[2].mxu0 }
 0x2e3   :  { %v276_v38 = vrot.slane %v271_v37, 6  ;;  %v927_v39 = vpop.f32.mrb[3].mxu0 }
 0x2e5   :  { %v278_v40 = vadd.f32 %v276_v38, %v1518_v26 }
 0x2e7   :  { %1307 = vtanh.f32 %v278_v40 }
 0x2f1   :  { %v1308_v41 = vpop.eup %1307 }
 0x2f2   :  { %v281_v42 = vrot.slane %v1308_v41, 2 }
 0x2f4   :  { %961 = vmatmul.mubr.f32.vlgmr.msra.gmra.mrb[2].mxu1 %v281_v42 }
 0x2f5   :  { %1225 = vmatpush3.bf16.msra.mxu1 %v1451_v5  ;;  %1030 = vmatprep.mubr.msk.f32.mxu1 %vm1396_vm0, %v1397_v1 }
 0x2f6   :  { %1226 = vmatprep.subr.bf16.mxu1 %v1395_v0 }
 0x2f9   :  { %1228 = vmatpush3.bf16.msra.mxu1 %v1454_v7 }
 0x2fa   :  { %1229 = vmatprep.subr.bf16.mxu1 %v1395_v0 }
 0x2fd   :  { %1231 = vmatpush3.bf16.msra.mxu1 %v1460_v10 }
 0x2fe   :  { %1232 = vmatprep.subr.bf16.mxu1 %v1395_v0 }
 0x301   :  { %1234 = vmatpush3.bf16.msra.mxu1 %v1466_v13 }
 0x302   :  { %1235 = vmatprep.subr.bf16.mxu1 %v1395_v0 }
 0x305   :  { %1237 = vmatpush3.bf16.msra.mxu1 %v1472_v16 }
 0x306   :  { %1238 = vmatprep.subr.bf16.mxu1 %v1395_v0 }
 0x309   :  { %1240 = vmatpush3.bf16.msra.mxu1 %v1478_v19 }
 0x30a   :  { %1241 = vmatprep.subr.bf16.mxu1 %v1395_v0 }
 0x30d   :  { %1243 = vmatpush3.bf16.msra.mxu1 %v1484_v22 }
 0x30e   :  { %1244 = vmatprep.subr.bf16.mxu1 %v1395_v0 }
 0x311   :  { %1246 = vmatpush3.bf16.msra.mxu1 %v1490_v25 }
 0x312   :  { %1271 = vmatprep.subr.bf16.mxu1 %v1395_v0 }
 0x3c7   :  { %v349_v43 = vpop.f32.mrb[2].mxu1 }
 0x3c8   :  { %v354_v44 = vrot.slane %v349_v43, 5  ;;  %v962_v45 = vpop.f32.mrb[3].mxu1 }
 0x3ca   :  { %v356_v46 = vadd.f32 %v354_v44, %v1518_v26 }
 0x3cc   :  { %1309 = vtanh.f32 %v356_v46 }
 0x3d6   :  { %v1310_v47 = vpop.eup %1309 }
 0x3d7   :  { %v359_v48 = vrot.slane %v1310_v47, 3 }
 0x3d9   :  { %996 = vmatmul.mubr.f32.vlgmr.msra.gmra.mrb[4].mxu0 %v359_v48 }
 0x3da   :  { %1249 = vmatpush3.bf16.msra.mxu0 %v1451_v5  ;;  %1065 = vmatprep.mubr.msk.f32.mxu0 %vm1396_vm0, %v1397_v1 }
 0x3db   :  { %1250 = vmatprep.subr.bf16.mxu0 %v1395_v0 }
 0x3de   :  { %1252 = vmatpush3.bf16.msra.mxu0 %v1454_v7 }
 0x3df   :  { %1253 = vmatprep.subr.bf16.mxu0 %v1395_v0 }
 0x3e2   :  { %1255 = vmatpush3.bf16.msra.mxu0 %v1460_v10 }
 0x3e3   :  { %1256 = vmatprep.subr.bf16.mxu0 %v1395_v0 }
 0x3e6   :  { %1258 = vmatpush3.bf16.msra.mxu0 %v1466_v13 }
 0x3e7   :  { %1259 = vmatprep.subr.bf16.mxu0 %v1395_v0 }
 0x3ea   :  { %1261 = vmatpush3.bf16.msra.mxu0 %v1472_v16 }
 0x3eb   :  { %1262 = vmatprep.subr.bf16.mxu0 %v1395_v0 }
 0x3ee   :  { %1264 = vmatpush3.bf16.msra.mxu0 %v1478_v19 }
 0x3ef   :  { %1265 = vmatprep.subr.bf16.mxu0 %v1395_v0 }
 0x3f2   :  { %1267 = vmatpush3.bf16.msra.mxu0 %v1484_v22 }
 0x3f3   :  { %1268 = vmatprep.subr.bf16.mxu0 %v1395_v0 }
 0x3f6   :  { %1270 = vmatpush3.bf16.msra.mxu0 %v1490_v25 }
 0x4ac   :  { %v427_v49 = vpop.f32.mrb[4].mxu0 }
 0x4ad   :  { %v432_v50 = vrot.slane %v427_v49, 4  ;;  %v997_v51 = vpop.f32.mrb[5].mxu0 }
 0x4af   :  { %v434_v52 = vadd.f32 %v432_v50, %v1518_v26 }
 0x4b1   :  { %1311 = vtanh.f32 %v434_v52 }
 0x4bb   :  { %v1312_v53 = vpop.eup %1311 }
 0x4bc   :  { %v437_v54 = vrot.slane %v1312_v53, 4 }
 0x4be   :  { %1031 = vmatmul.mubr.f32.vlgmr.msra.gmra.mrb[4].mxu1 %v437_v54 }
 0x4bf   :  { %1273 = vmatpush3.bf16.msra.mxu1 %v1451_v5  ;;  %1100 = vmatprep.mubr.msk.f32.mxu1 %vm1396_vm0, %v1397_v1 }
 0x4c0   :  { %1274 = vmatprep.subr.bf16.mxu1 %v1395_v0 }
 0x4c3   :  { %1276 = vmatpush3.bf16.msra.mxu1 %v1454_v7 }
 0x4c4   :  { %1277 = vmatprep.subr.bf16.mxu1 %v1395_v0 }
 0x4c7   :  { %1279 = vmatpush3.bf16.msra.mxu1 %v1460_v10 }
 0x4c8   :  { %1280 = vmatprep.subr.bf16.mxu1 %v1395_v0 }
 0x4cb   :  { %1282 = vmatpush3.bf16.msra.mxu1 %v1466_v13 }
 0x4cc   :  { %1283 = vmatprep.subr.bf16.mxu1 %v1395_v0 }
 0x4cf   :  { %1285 = vmatpush3.bf16.msra.mxu1 %v1472_v16 }
 0x4d0   :  { %1286 = vmatprep.subr.bf16.mxu1 %v1395_v0 }
 0x4d3   :  { %1288 = vmatpush3.bf16.msra.mxu1 %v1478_v19 }
 0x4d4   :  { %1289 = vmatprep.subr.bf16.mxu1 %v1395_v0 }
 0x4d7   :  { %1291 = vmatpush3.bf16.msra.mxu1 %v1484_v22 }
 0x4d8   :  { %1292 = vmatprep.subr.bf16.mxu1 %v1395_v0 }
 0x4db   :  { %1294 = vmatpush3.bf16.msra.mxu1 %v1490_v25 }
 0x591   :  { %v505_v55 = vpop.f32.mrb[4].mxu1 }
 0x592   :  { %v510_v56 = vrot.slane %v505_v55, 3  ;;  %v1032_v57 = vpop.f32.mrb[5].mxu1 }
 0x594   :  { %v512_v58 = vadd.f32 %v510_v56, %v1518_v26 }
 0x596   :  { %1313 = vtanh.f32 %v512_v58 }
 0x5a0   :  { %v1314_v59 = vpop.eup %1313 }
 0x5a1   :  { %v515_v60 = vrot.slane %v1314_v59, 5 }
 0x5a3   :  { %1066 = vmatmul.mubr.f32.vlgmr.msra.gmra.mrb[6].mxu0 %v515_v60 }
 0x676   :  { %v583_v61 = vpop.f32.mrb[6].mxu0 }
 0x677   :  { %v588_v62 = vrot.slane %v583_v61, 2  ;;  %v1067_v63 = vpop.f32.mrb[7].mxu0 }
 0x679   :  { %v590_v1 = vadd.f32 %v588_v62, %v1518_v26 }
 0x67b   :  { %1315 = vtanh.f32 %v590_v1 }
 0x685   :  { %v1316_v2 = vpop.eup %1315 }
 0x686   :  { %v593_v3 = vrot.slane %v1316_v2, 6 }
 0x688   :  { %1101 = vmatmul.mubr.f32.vlgmr.msra.gmra.mrb[6].mxu1 %v593_v3 }
 0x75b   :  { %v661_v0 = vpop.f32.mrb[6].mxu1 }
 0x75c   :  { %v666_v4 = vrot.slane %v661_v0, 1  ;;  %v1102_v5 = vpop.f32.mrb[7].mxu1 }
 0x75e   :  { %v668_v6 = vadd.f32 %v666_v4, %v1518_v26 }
 0x760   :  { %1317 = vtanh.f32 %v668_v6 }
 0x76a   :  { %v1318_v7 = vpop.eup %1317 }
 0x76b   :  { %670 = vst [vmem:[#allocation7 - $0x7] sm:$0x80] %v1318_v7 }
 0x76c   :  { %1374 = shalt.err (!%p1371_p6)
}
 0x76d   :  { %s1375_s11 = scalar_lea.hbm %s1630_s2, 16 }
 0x76e   :  { %p1376_p7 = scmp.ne.s32.totalorder %s1630_s2, %s1375_s11  ;;  %p1379_p8 = scmp.lt.u32.totalorder %s1375_s11, %s1630_s2 }
 0x770   :  { %p1381_p9 = pnand %p1379_p8, %p1376_p7 }
 0x772   :  { %1384 = shalt.err (!%p1381_p9)
}
 0x773   :  { %680 = dma.vmem_to_hbm [thread:$0]  %s678_s6, 16, %s1630_s2, [#allocation4]  }
 0x774   :  { %1389 = dma.done.wait [#allocation4], 16  }
 0x775   :  { %1390 = vsyncadd [#allocation4], 4294967280 }
 0x776   :  { %684 = vsyncpa [#allocation3], 1 }
 0x777   :  { %685 = vsyncpa [#allocation6], 1 }
 0x778   :  { %686 = vsyncpa [#allocation4], 1 }

</bundles_post_ra>
